<compile_context>
chip_gen: v6e
topology: v6e:2x2x1
jax: 0.10.0
libtpu: 0.0.40
codegen_flags: <defaults>
</compile_context>

<pallas_src>
import functools

import jax
import jax.numpy as jnp
from jax import lax
from jax.experimental import pallas as pl
from jax.experimental.pallas import tpu as pltpu

LANE = 128


# ----------------------------------------------------------------------------- #
# Kernel: one GINConv('mean') layer on a (dst-tile, src-tile) grid.
# ----------------------------------------------------------------------------- #
def gin_conv_kernel(hsrc_ref, hdst_ref, adj_ref, w_ref, b_ref, out_ref,
                    acc_ref, deg_ref, *, eps, apply_activation,
                    use_edge_weight, n_src, ts, src_ragged):
    """Grid = (dst_tiles, src_tiles); src axis (last) is the reduction axis.

    hsrc_ref : (ts, Fin)    bf16 source-node feature tile
    hdst_ref : (td, Fin)    bf16 destination-node feature tile (= h[:N_dst] rows)
    adj_ref  : (td, ts)     weighted adjacency tile (any float dtype)
    w_ref    : (Fin, Fout)  bf16 GINConv apply_func Linear weight
    b_ref    : (1,  Fout)   f32 Linear bias
    out_ref  : (td, Fout)
    acc_ref  : (td, Fin)    f32 scratch, running sum of neighbor messages
    deg_ref  : (td, 1)      f32 scratch, running in-degree (edge count)
    """
    j = pl.program_id(1)

    @pl.when(j == 0)
    def _():
        acc_ref[...] = jnp.zeros_like(acc_ref)
        deg_ref[...] = jnp.zeros_like(deg_ref)

    adj = adj_ref[...]                    # (td, ts)
    h_src = hsrc_ref[...]                 # (ts, Fin) bf16

    if src_ragged:
        # Ragged src tail handled in-kernel (no HBM-side pad copy of adj):
        # zero the out-of-range adj columns AND h rows so OOB garbage (possibly
        # NaN/Inf) cannot contaminate the reduction.
        valid = jnp.minimum(n_src - j * ts, ts)
        col_ids = lax.broadcasted_iota(jnp.int32, adj.shape, 1)
        adj = jnp.where(col_ids < valid, adj, 0.0)
        row_ids = lax.broadcasted_iota(jnp.int32, h_src.shape, 0)
        h_src = jnp.where(row_ids < valid, h_src, 0.0)

    # NOTE: edges with weight exactly 0 are indistinguishable from "no edge" in the
    # dense adjacency format (adj > 0 gates both the message and the degree).
    present = adj > 0.0
    if use_edge_weight:                       # u_mul_e: message = h_src[j] * w_ij
        msg = adj.astype(jnp.bfloat16)
    else:                                     # copy_u: message = h_src[j]
        msg = present.astype(jnp.bfloat16)    # indicator straight to bf16

    # Neighbor-message sum rides on the MXU: (td, ts) @ (ts, Fin), f32 accumulate.
    acc_ref[...] += jnp.dot(msg, h_src, preferred_element_type=jnp.float32)
    # In-degree (edge count) for the 'mean' reducer (XLU lane reduce).
    deg_ref[...] += jnp.sum(present.astype(jnp.float32), axis=-1, keepdims=True)

    @pl.when(j == pl.num_programs(1) - 1)
    def _():
        # mean over incoming edges; deg == 0 -> neigh stays 0 (DGL semantics).
        inv_deg = pl.reciprocal(jnp.maximum(deg_ref[...], 1.0), approx=False)
        neigh = acc_ref[...] * inv_deg                           # (td, Fin) f32
        rst = (1.0 + eps) * hdst_ref[...].astype(jnp.float32) + neigh
        out = jnp.dot(rst.astype(jnp.bfloat16), w_ref[...],
                      preferred_element_type=jnp.float32)
        out = out + b_ref[...]
        if apply_activation:
            # TODO(synk): reference takes `activation` as a constructor arg; ReLU assumed.
            out = jnp.maximum(out, 0.0)
        out_ref[...] = out.astype(out_ref.dtype)


# ----------------------------------------------------------------------------- #
# Wrapper: tiling / pallas_call. Feature dims must already be multiples of 128.
# ----------------------------------------------------------------------------- #
def _round_up(n, m):
    return ((n + m - 1) // m) * m


def gin_conv(h, adj, w, b, *, eps=0.0, apply_activation, use_edge_weight,
             out_dtype=jnp.float32, max_td=512, max_ts=2048):
    """One GINConv('mean') layer.  h: (N_src, Fin); adj: (N_dst, N_src)."""
    n_dst, n_src = adj.shape
    fin, fout = w.shape
    assert h.shape == (n_src, fin)
    assert n_dst <= n_src, "DGL block convention: dst nodes are a prefix of src nodes"
    assert fin % LANE == 0 and fout % LANE == 0, "pad feature dims to 128 lanes first"
    assert max_ts % LANE == 0 and max_td % 8 == 0

    # bf16 MXU inputs, cast once here (amortized: h_src is re-read once per dst tile).
    h_bf = h.astype(jnp.bfloat16)
    w_bf = w.astype(jnp.bfloat16)
    b_f32 = b.astype(jnp.float32).reshape(1, fout)

    # dst tile: multiple of 8; >= 2 blocks whenever n_dst > 8 so both v7x
    # TensorCores (sharded via the "parallel" grid axis) are busy.
    td = max(8, min(max_td, _round_up(-(-n_dst // 2), 8)))
    # src (reduction) tile: full extent if it fits, else a multiple of 128.
    ts = n_src if n_src <= max_ts else max_ts
    src_ragged = (n_src % ts) != 0            # only possible when n_src > max_ts

    grid = (pl.cdiv(n_dst, td), pl.cdiv(n_src, ts))

    kernel = functools.partial(
        gin_conv_kernel, eps=eps, apply_activation=apply_activation,
        use_edge_weight=use_edge_weight, n_src=n_src, ts=ts, src_ragged=src_ragged)

    out = pl.pallas_call(
        kernel,
        out_shape=jax.ShapeDtypeStruct((n_dst, fout), out_dtype),
        grid_spec=pltpu.PrefetchScalarGridSpec(
            num_scalar_prefetch=0,
            grid=grid,
            in_specs=[
                pl.BlockSpec((ts, fin), lambda i, j: (j, 0)),    # h_src tile
                pl.BlockSpec((td, fin), lambda i, j: (i, 0)),    # h_dst tile (same array)
                # NOTE: if the adj DMA shows up exposed (tiny Fin), sweep
                # pipeline_mode=pl.Buffered(3) here — VMEM headroom is ample.
                pl.BlockSpec((td, ts), lambda i, j: (i, j)),     # adjacency tile
                pl.BlockSpec((fin, fout), lambda i, j: (0, 0)),  # W (resident)
                pl.BlockSpec((1, fout), lambda i, j: (0, 0)),    # bias
            ],
            out_specs=pl.BlockSpec((td, fout), lambda i, j: (i, 0)),
            scratch_shapes=[
                pltpu.VMEM((td, fin), jnp.float32),   # message-sum accumulator
                pltpu.VMEM((td, 1), jnp.float32),     # in-degree accumulator
            ],
        ),
        compiler_params=pltpu.CompilerParams(
            dimension_semantics=("parallel", "arbitrary"),
            # ~10-20 MiB actual footprint at default tiles; 48 MiB leaves headroom
            # for deeper adj buffering while staying inside v7x's 64 MiB VMEM.
            vmem_limit_bytes=48 * 1024 * 1024,
        ),
    )(h_bf, h_bf, adj, w_bf, b_f32)

    return out


# ----------------------------------------------------------------------------- #
# GINEMB forward: attrMask -> n_layers of GINConv('mean') -> act/dropout between.
# ----------------------------------------------------------------------------- #
def attr_mask(x, prob_attr, key):
    # Reference attrMask (literal): mask = rand(F) < prob; x = x * mask
    # i.e. KEEP a feature column where rand < prob_attr.
    mask = (jax.random.uniform(key, (x.shape[1],)) < prob_attr).astype(x.dtype)
    return x * mask[None, :]


def _pad_last(x, target):
    pad = target - x.shape[-1]
    if pad:
        x = jnp.pad(x, [(0, 0)] * (x.ndim - 1) + [(0, pad)])
    return x


def pad_gin_params(w, b, lane=LANE):
    fin, fout = w.shape
    fin_p, fout_p = _round_up(fin, lane), _round_up(fout, lane)
    w_p = jnp.pad(w, ((0, fin_p - fin), (0, fout_p - fout)))
    b_p = jnp.pad(b.reshape(1, -1), ((0, 0), (0, fout_p - fout)))
    return w_p, b_p


def ginemb_forward(layer_params, x, adjs, *, train, prob_attr, dropout_p, rng_key):
    k_mask, k_drop = jax.random.split(rng_key)
    if train:
        x = attr_mask(x, prob_attr, k_mask)

    n_layers = len(layer_params)
    out_feats = layer_params[-1]["w"].shape[1]

    # Pad the feature (lane) dim once to a multiple of 128; each layer then emits an
    # already-padded output, so intermediate h never drops below 128 lanes.  Padded
    # columns stay exactly zero (zero W rows/cols, zero bias, relu(0)=0).
    h = _pad_last(x, _round_up(x.shape[1], LANE))

    for l, (params, adj) in enumerate(zip(layer_params, adjs)):
        last = (l == n_layers - 1)
        w_p, b_p = pad_gin_params(params["w"], params["b"])
        h = gin_conv(
            h, adj, w_p, b_p,
            eps=0.0,                         # DGL GINConv default init_eps
            apply_activation=not last,       # fused ReLU on non-last layers
            use_edge_weight=train,           # edge weights only when training
            out_dtype=jnp.float32 if last else jnp.bfloat16,  # bf16 intermediates
        )
        if not last and train and dropout_p > 0.0:
            k_drop, kd = jax.random.split(k_drop)
            keep = jax.random.bernoulli(kd, 1.0 - dropout_p, h.shape)
            h = jnp.where(keep, h / (1.0 - dropout_p), 0.0).astype(h.dtype)

    return h[:, :out_feats]


def init_gin_layer(key, in_feats, out_feats):
    # Mimics nn.Linear default uniform(-1/sqrt(in), 1/sqrt(in)) init.
    k_w, k_b = jax.random.split(key)
    bound = (1.0 / in_feats) ** 0.5
    return {
        "w": jax.random.uniform(k_w, (in_feats, out_feats), jnp.float32, -bound, bound),
        "b": jax.random.uniform(k_b, (1, out_feats), jnp.float32, -bound, bound),
    }


if __name__ == "__main__":
    # Module-consistent small config:
    #   GINEMB(in_feats=8, n_hidden=32, n_output_dim=16, n_layers=2, activation=ReLU)
    in_feats, n_hidden, n_output_dim = 8, 32, 16
    n_layers = 2
    n_nodes = 16
    prob_attr = 0.5
    dropout_p = 0.0

    root = jax.random.PRNGKey(0)
    k_x, k_adj, k_p, k_rng = jax.random.split(root, 4)

    # Node features (N_src of the first block, F).
    x = jax.random.normal(k_x, (n_nodes, in_feats), jnp.float32)

    # DGL-style sampled blocks as dense weighted adjacencies (N_dst, N_src),
    # materialized directly in bf16 at the source (adj is the dominant HBM stream):
    #   layer 0: 16 src -> 12 dst ; layer 1: 12 src -> 8 dst.
    dst_counts = [12, 8]
    src_counts = [n_nodes, 12]
    adjs = []
    ka = k_adj
    for nd, ns in zip(dst_counts, src_counts):
        ka, k1, k2 = jax.random.split(ka, 3)
        present = (jax.random.uniform(k1, (nd, ns)) < 0.4).astype(jnp.float32)
        present = jnp.maximum(present, jnp.eye(nd, ns, dtype=jnp.float32))  # >=1 in-edge
        weights = jax.random.uniform(k2, (nd, ns), minval=0.1, maxval=1.0)
        adjs.append((present * weights).astype(jnp.bfloat16))

    # Layer Linears: (8 -> 32), (32 -> 16).
    dims = [in_feats] + [n_hidden] * (n_layers - 1) + [n_output_dim]
    keys = jax.random.split(k_p, n_layers)
    layer_params = [init_gin_layer(keys[l], dims[l], dims[l + 1])
                    for l in range(n_layers)]

    out = ginemb_forward(layer_params, x, adjs, train=True,
                         prob_attr=prob_attr, dropout_p=dropout_p, rng_key=k_rng)
    out = jax.block_until_ready(out)

    assert out.shape == (dst_counts[-1], n_output_dim), out.shape
    assert bool(jnp.all(jnp.isfinite(out)))
    print("KERNEL_OK")
</pallas_src>

<mosaic_0001>
module attributes {stable_mosaic.version = 11 : i64} {
  func.func @gin_conv_kernel(%arg0: i32, %arg1: i32, %arg2: memref<16x128xbf16, #tpu.memory_space<vmem>>, %arg3: memref<8x128xbf16, #tpu.memory_space<vmem>>, %arg4: memref<8x16xbf16, #tpu.memory_space<vmem>>, %arg5: memref<128x128xbf16, #tpu.memory_space<vmem>>, %arg6: memref<1x128xf32, #tpu.memory_space<vmem>>, %arg7: memref<8x128xbf16, #tpu.memory_space<vmem>>, %arg8: memref<8x128xf32, #tpu.memory_space<vmem>>, %arg9: memref<8x1xf32, #tpu.memory_space<vmem>>) attributes {dimension_semantics = [#tpu.dimension_semantics<parallel>, #tpu.dimension_semantics<arbitrary>], iteration_bounds = array<i64: 2, 1>, scalar_prefetch = 0 : i64, scratch_operands = 2 : i64, tpu.core_type = #tpu.core_type<tc>, window_params = [{transform_indices = @transform_0, window_bounds = array<i64: 16, 128>}, {transform_indices = @transform_1, window_bounds = array<i64: 8, 128>}, {transform_indices = @transform_2, window_bounds = array<i64: 8, 16>}, {pipeline_mode = #tpu.pipeline_mode<synchronous>, transform_indices = @transform_3, window_bounds = array<i64: 128, 128>}, {pipeline_mode = #tpu.pipeline_mode<synchronous>, transform_indices = @transform_4, window_bounds = array<i64: 1, 128>}, {transform_indices = @transform_5, window_bounds = array<i64: 8, 128>}]} {
    %c0_i32 = arith.constant 0 : i32
    %0 = arith.cmpi eq, %arg1, %c0_i32 : i32
    %1 = arith.extui %0 : i1 to i32
    %c0_i32_0 = arith.constant 0 : i32
    %2 = arith.cmpi ne, %1, %c0_i32_0 : i32
    scf.if %2 {
      %cst_16 = arith.constant 0.000000e+00 : f32
      %21 = vector.broadcast %cst_16 : f32 to vector<8x128xf32>
      %c0_17 = arith.constant 0 : index
      %c0_18 = arith.constant 0 : index
      %22 = vector.load %arg8[%c0_17, %c0_18] : memref<8x128xf32, #tpu.memory_space<vmem>>, vector<8x128xf32>
      tpu.vector_store %arg8[%c0_17, %c0_18], %21 {strides = array<i32>} : memref<8x128xf32, #tpu.memory_space<vmem>>, vector<8x128xf32>,
      %cst_19 = arith.constant 0.000000e+00 : f32
      %23 = vector.broadcast %cst_19 : f32 to vector<8x1xf32>
      %c0_20 = arith.constant 0 : index
      %c0_21 = arith.constant 0 : index
      %24 = vector.load %arg9[%c0_20, %c0_21] : memref<8x1xf32, #tpu.memory_space<vmem>>, vector<8x1xf32>
      tpu.vector_store %arg9[%c0_20, %c0_21], %23 {strides = array<i32>} : memref<8x1xf32, #tpu.memory_space<vmem>>, vector<8x1xf32>,
    } else {
    }
    %c0 = arith.constant 0 : index
    %c0_1 = arith.constant 0 : index
    %3 = vector.load %arg4[%c0, %c0_1] : memref<8x16xbf16, #tpu.memory_space<vmem>>, vector<8x16xbf16>
    %c0_2 = arith.constant 0 : index
    %c0_3 = arith.constant 0 : index
    %4 = vector.load %arg2[%c0_2, %c0_3] : memref<16x128xbf16, #tpu.memory_space<vmem>>, vector<16x128xbf16>
    %cst = arith.constant 0.000000e+00 : bf16
    %5 = vector.broadcast %cst : bf16 to vector<8x16xbf16>
    %6 = arith.cmpf ogt, %3, %5 : vector<8x16xbf16>
    %c0_4 = arith.constant 0 : index
    %c0_5 = arith.constant 0 : index
    %7 = vector.load %arg8[%c0_4, %c0_5] : memref<8x128xf32, #tpu.memory_space<vmem>>, vector<8x128xf32>
    %cst_6 = arith.constant dense<0.000000e+00> : vector<8x128xf32>
    %8 = tpu.matmul %3, %4, %cst_6 {dimension_numbers = #tpu.dot_dimension_numbers<[1], [0], [0], [1], [0, 0, 1, 1], [], []>} : vector<8x16xbf16>, vector<16x128xbf16>, vector<8x128xf32> -> vector<8x128xf32>
    %9 = arith.addf %7, %8 : vector<8x128xf32>
    %c0_7 = arith.constant 0 : index
    %c0_8 = arith.constant 0 : index
    %10 = vector.load %arg8[%c0_7, %c0_8] : memref<8x128xf32, #tpu.memory_space<vmem>>, vector<8x128xf32>
    tpu.vector_store %arg8[%c0_7, %c0_8], %9 {strides = array<i32>} : memref<8x128xf32, #tpu.memory_space<vmem>>, vector<8x128xf32>,
    %c0_9 = arith.constant 0 : index
    %c0_10 = arith.constant 0 : index
    %11 = vector.load %arg9[%c0_9, %c0_10] : memref<8x1xf32, #tpu.memory_space<vmem>>, vector<8x1xf32>
    %12 = arith.extui %6 : vector<8x16xi1> to vector<8x16xi32>
    %13 = arith.sitofp %12 : vector<8x16xi32> to vector<8x16xf32>
    %cst_11 = arith.constant dense<0.000000e+00> : vector<8xf32>
    %14 = vector.multi_reduction <add>, %13, %cst_11 [1] : vector<8x16xf32> to vector<8xf32>
    %15 = vector.shape_cast %14 : vector<8xf32> to vector<8x1xf32>
    %16 = arith.addf %11, %15 : vector<8x1xf32>
    %c0_12 = arith.constant 0 : index
    %c0_13 = arith.constant 0 : index
    %17 = vector.load %arg9[%c0_12, %c0_13] : memref<8x1xf32, #tpu.memory_space<vmem>>, vector<8x1xf32>
    tpu.vector_store %arg9[%c0_12, %c0_13], %16 {strides = array<i32>} : memref<8x1xf32, #tpu.memory_space<vmem>>, vector<8x1xf32>,
    %c0_i32_14 = arith.constant 0 : i32
    %18 = arith.cmpi eq, %arg1, %c0_i32_14 : i32
    %19 = arith.extui %18 : i1 to i32
    %c0_i32_15 = arith.constant 0 : i32
    %20 = arith.cmpi ne, %19, %c0_i32_15 : i32
    scf.if %20 {
      %c0_16 = arith.constant 0 : index
      %c0_17 = arith.constant 0 : index
      %21 = vector.load %arg9[%c0_16, %c0_17] : memref<8x1xf32, #tpu.memory_space<vmem>>, vector<8x1xf32>
      %cst_18 = arith.constant 1.000000e+00 : f32
      %22 = vector.broadcast %cst_18 : f32 to vector<8x1xf32>
      %23 = arith.maximumf %21, %22 : vector<8x1xf32>
      %24 = tpu.reciprocal %23 : vector<8x1xf32> -> vector<8x1xf32>
      %c0_19 = arith.constant 0 : index
      %c0_20 = arith.constant 0 : index
      %25 = vector.load %arg8[%c0_19, %c0_20] : memref<8x128xf32, #tpu.memory_space<vmem>>, vector<8x128xf32>
      %26 = vector.broadcast %24 : vector<8x1xf32> to vector<8x128xf32>
      %27 = arith.mulf %25, %26 : vector<8x128xf32>
      %c0_21 = arith.constant 0 : index
      %c0_22 = arith.constant 0 : index
      %28 = vector.load %arg3[%c0_21, %c0_22] : memref<8x128xbf16, #tpu.memory_space<vmem>>, vector<8x128xbf16>
      %29 = arith.extf %28 : vector<8x128xbf16> to vector<8x128xf32>
      %cst_23 = arith.constant 1.000000e+00 : f32
      %30 = vector.broadcast %cst_23 : f32 to vector<8x128xf32>
      %31 = arith.mulf %30, %29 : vector<8x128xf32>
      %32 = arith.addf %31, %27 : vector<8x128xf32>
      %33 = arith.truncf %32 : vector<8x128xf32> to vector<8x128xbf16>
      %c0_24 = arith.constant 0 : index
      %c0_25 = arith.constant 0 : index
      %34 = vector.load %arg5[%c0_24, %c0_25] : memref<128x128xbf16, #tpu.memory_space<vmem>>, vector<128x128xbf16>
      %cst_26 = arith.constant dense<0.000000e+00> : vector<8x128xf32>
      %35 = tpu.matmul %33, %34, %cst_26 {dimension_numbers = #tpu.dot_dimension_numbers<[1], [0], [0], [1], [0, 0, 1, 1], [], []>} : vector<8x128xbf16>, vector<128x128xbf16>, vector<8x128xf32> -> vector<8x128xf32>
      %c0_27 = arith.constant 0 : index
      %c0_28 = arith.constant 0 : index
      %36 = vector.load %arg6[%c0_27, %c0_28] : memref<1x128xf32, #tpu.memory_space<vmem>>, vector<1x128xf32>
      %37 = vector.broadcast %36 : vector<1x128xf32> to vector<8x128xf32>
      %38 = arith.addf %35, %37 : vector<8x128xf32>
      %cst_29 = arith.constant 0.000000e+00 : f32
      %39 = vector.broadcast %cst_29 : f32 to vector<8x128xf32>
      %40 = arith.maximumf %38, %39 : vector<8x128xf32>
      %41 = arith.truncf %40 : vector<8x128xf32> to vector<8x128xbf16>
      %c0_30 = arith.constant 0 : index
      %c0_31 = arith.constant 0 : index
      %42 = vector.load %arg7[%c0_30, %c0_31] : memref<8x128xbf16, #tpu.memory_space<vmem>>, vector<8x128xbf16>
      tpu.vector_store %arg7[%c0_30, %c0_31], %41 {strides = array<i32>} : memref<8x128xbf16, #tpu.memory_space<vmem>>, vector<8x128xbf16>,
    } else {
    }
    return
  }
  func.func @transform_0(%arg0: i32, %arg1: i32) -> (i32, i32) {
    %c0_i32 = arith.constant 0 : i32
    %c0_i32_0 = arith.constant 0 : i32
    return %arg1, %c0_i32 : i32, i32
  }
  func.func @transform_1(%arg0: i32, %arg1: i32) -> (i32, i32) {
    %c0_i32 = arith.constant 0 : i32
    %c0_i32_0 = arith.constant 0 : i32
    return %arg0, %c0_i32 : i32, i32
  }
  func.func @transform_2(%arg0: i32, %arg1: i32) -> (i32, i32) {
    %c0_i32 = arith.constant 0 : i32
    return %arg0, %arg1 : i32, i32
  }
  func.func @transform_3(%arg0: i32, %arg1: i32) -> (i32, i32) {
    %c0_i32 = arith.constant 0 : i32
    %c0_i32_0 = arith.constant 0 : i32
    %c0_i32_1 = arith.constant 0 : i32
    return %c0_i32, %c0_i32_0 : i32, i32
  }
  func.func @transform_4(%arg0: i32, %arg1: i32) -> (i32, i32) {
    %c0_i32 = arith.constant 0 : i32
    %c0_i32_0 = arith.constant 0 : i32
    %c0_i32_1 = arith.constant 0 : i32
    return %c0_i32, %c0_i32_0 : i32, i32
  }
  func.func @transform_5(%arg0: i32, %arg1: i32) -> (i32, i32) {
    %c0_i32 = arith.constant 0 : i32
    %c0_i32_0 = arith.constant 0 : i32
    return %arg0, %c0_i32 : i32, i32
  }
}

</mosaic_0001>

<bundles_post_ra>
// kernel: tpu_custom_call.1
= control target key start
LH: loop header
LB: loop body
LE: loop exit
PB: predicated region body
PF: predicated region fallthrough
CT: control target
= control target key end

     0   :  { %s1314_s0 = inlined_call_operand.hbm [shape: bf16[16,128], index: 0, kind: input, shape index: {}]   ;;  %s1315_s1 = inlined_call_operand.hbm [shape: bf16[16,128], index: 1, kind: input, shape index: {}]   ;;  %s1316_s2 = inlined_call_operand.hbm [shape: bf16[12,16], index: 2, kind: input, shape index: {}]   ;;  %s1317_s3 = inlined_call_operand.hbm [shape: bf16[128,128], index: 3, kind: input, shape index: {}]   ;;  %s1318_s4 = inlined_call_operand.vmem [shape: f32[1,128], index: 4, kind: input, shape index: {}]   ;;  %s1319_s5 = inlined_call_operand.hbm [shape: bf16[12,128], index: 5, kind: output, shape index: {}]  }
   0x1   :  { %1325 = sst [smem:[#allocation18_spill]] %s1315_s1 }
   0x2   :  { %10 = vsyncpa [#allocation5], 0 }
   0x3   :  { %11 = vsyncpa [#allocation8], 0 }
   0x4   :  { %13 = vsyncpa [#allocation8 + $0x1], 0 }
   0x5   :  { %14 = vsyncpa [#allocation11], 0 }
   0x6   :  { %15 = vsyncpa [#allocation6], 0 }
   0x7   :  { %17 = vsyncpa [#allocation6 + $0x1], 0  ;;  %s1087_s18 = smov 0   ;;  %s1089_s19 = smov 0  }
   0x8   :  { %s1091_s20 = smov 0   ;;  %s1093_s21 = smov 0  }
   0x9   :  { %s1095_s22 = smov 0   ;;  %s1097_s23 = smov 0  }
   0xa LB: > { %s35_s24 = sadd.s32 1, %s1041_s22  ;;  %s68_s25 = sadd.s32 1, %s1033_s20  ;;  %s1045_s23 = sphi %s1097_s23, %s23_s23   ;;  %s1041_s22 = sphi %s1095_s22, %s1348_s22   ;;  %s1037_s21 = sphi %s1093_s21, %s1347_s21   ;;  %s1033_s20 = sphi %s1091_s20, %s1346_s20   ;;  %s1029_s19 = sphi %s1089_s19, %s1345_s19   ;;  %s1025_s18 = sphi %s1087_s18, %s1344_s18  }
   0xb   : > { %p37_p0 = scmp.ge.s32.totalorder %s35_s24, 2  ;;  %p75_p1 = scmp.ne.s32.totalorder %s1033_s20, %s1029_s19 }
   0xc   : > { %p76_p2 = scmp.eq.s32.totalorder %s1045_s23, 0  ;;  %p778_p5 = scmp.lt.s32.totalorder %s1045_s23, 2 }
   0xd   : > { %s1350_s24 = smov (%p37_p0, %s35_s24), 0  ;;  %s233_s27 = sand.u32 1, %s1045_s23  }
   0xe   : > { %1326 = sst [smem:[#allocation17_spill]] %s1350_s24  ;;  %p77_p4 = por %p76_p2, %p75_p1 }
   0xf   : > { %s65_s26 = ssub.s32 %s1041_s22, %s1350_s24  ;;  %s235_s28 = sand.u32 1, %s1033_s20  }
  0x10   : > { %p66_p6 = scmp.eq.s32.totalorder %s65_s26, 0  ;;  %s682_s29 = sshll.u32 %s1041_s22, 6 }
  0x11   : > { %s1137_s6 = sshll.u32 %s235_s28, 2  ;;  %s1327_s1 = sld [smem:[#allocation18_spill]] }
  0x12   : > { %s1135_s30 = scalar_select %p66_p6, %s1033_s20, %s68_s25  }
  0x13   : > { %p1144_p7 = pnand %p778_p5, %p77_p4  ;;  %s237_s11 = scalar_lea.vmem [#allocation7], %s1137_s6 }
  0x14   : > { %s244_s12 = sshll.u32 %s237_s11, 4  ;;  %s1149_s13 = scalar_lea.sflag [#allocation8], %s233_s27  ;;  %s245_s12 = int_to_ptr.vmem [resolvable:$true] %s244_s12 }
  0x15   : > { %p1322_p8 = pneg %p1144_p7  ;;  %s862_s14 = scalar_lea.vmem %s245_s12, 64 }
  0x16   : > { %p863_p9 = scmp.ne.s32.totalorder %s245_s12, %s862_s14  ;;  %s1047_s15 = smov [#allocation7]  }
  0x17   : > { %s242_s9 = scalar_lea.hbm %s1327_s1, %s682_s29  ;;  %s867_s16 = sshll.u32 %s1047_s15, 4  ;;  %s868_s16 = int_to_ptr.vmem [resolvable:$false] %s867_s16 }
  0x18   : > { %p865_p10 = pnand %p863_p9, %p1322_p8  ;;  %s869_s17 = scalar_lea.vmem %s868_s16, 128 }
  0x19   : > { %p870_p12 = scmp.lt.s32.totalorder %s245_s12, %s868_s16  ;;  %p871_p13 = scmp.lt.s32.totalorder %s869_s17, %s862_s14 }
  0x1a   : > { %p866_p11 = pneg %p865_p10 }
  0x1b   : > { %p872_p0 = por %p871_p13, %p870_p12 }
  0x1d   : > { %p873_p2 = pnand %p872_p0, %p866_p11 }
  0x1f   : > { %876 = shalt.err (!%p873_p2)
}
  0x20   : > { %768 = dma.hbm_to_vmem [thread:$0]  (!%p1144_p7), %s242_s9, 64, %s245_s12, %s1149_s13  }
  0x21   : > { %s1160_s25 = sadd.s32 4294967295, %s1045_s23   ;;  %s676_s26 = sadd.s32 4294967294, %s1045_s23  }
  0x22   : > { %p81_p4 = scmp.ne.s32.totalorder %s1029_s19, %s1025_s18  ;;  %p1321_p5 = scmp.eq.s32.totalorder %s1160_s25, 0 }
  0x23   : > { %p175_p6 = scmp.eq.s32.totalorder %s1160_s25, 1  ;;  %p181_p9 = scmp.eq.s32.totalorder %s676_s26, 1 }
  0x24   : > { %p677_p10 = scmp.ge.s32.totalorder %s1045_s23, 1  ;;  %p1170_p11 = por %p1321_p5, %p81_p4 }
  0x25   : > { %p1177_p12 = por %p175_p6, %p75_p1  ;;  %p1181_p13 = por %p181_p9, %p81_p4 }
  0x26   : > { %s1329_s27 = scalar_select %p1170_p11, 1, 0 }
  0x27   : > { %s1330_s28 = scalar_select %p1177_p12, 1, 0 }
  0x28   : > { %s1331_s7 = scalar_select %p1181_p13, 1, 0 }
  0x29   : > { %p188_p0 = scmp.lt.s32.totalorder %s1045_s23, 3  ;;  %s1048_s9 = smov [#allocation4]  }
  0x2a   : > { %s203_s11 = sshll.u32 %s1048_s9, 4  ;;  %s255_s12 = scalar_lea.vmem [#allocation9], %s1137_s6  ;;  %s204_s11 = int_to_ptr.vmem [resolvable:$true] %s203_s11 }
  0x2b   : > { %p1186_p2 = pnand %p677_p10, %p188_p0  ;;  %s263_s14 = sshll.u32 %s255_s12, 4  ;;  %s1206_s14 = int_to_ptr.vmem [resolvable:$true] %s263_s14 }
  0x2c   : > { %s1049_s16 = smov [#allocation10]   ;;  %s1204_s24 = scalar_lea.hbm %s1316_s2, %s682_s29 }
  0x2d   : > { %p758_p3 = pneg %p1186_p2  ;;  %s216_s17 = sshll.u32 %s1049_s16, 4  ;;  %s217_s17 = int_to_ptr.vmem [resolvable:$true] %s216_s17 }
  0x2e   : > { %s888_s6 = scalar_lea.vmem %s204_s11, 128  ;;  %p896_p10 = scmp.lt.s32.totalorder %s204_s11, %s204_s11 }
  0x2f   : > { %p1195_p1 = pnand %p758_p3, %p1321_p5  ;;  %p889_p3 = scmp.ne.s32.totalorder %s204_s11, %s888_s6 }
  0x30   : > { %p897_p0 = scmp.lt.s32.totalorder %s888_s6, %s888_s6 }
  0x31   : > { %p879_p4 = pneg %p1195_p1 }
  0x32   : > { %p898_p5 = por %p897_p0, %p896_p10 }
  0x33   : > { %p891_p6 = pnand %p889_p3, %p879_p4 }
  0x35   : > { %p892_p9 = pneg %p891_p6 }
  0x37   : > { %p899_p8 = pnand %p898_p5, %p892_p9 }
  0x39   : > { %902 = shalt.err (!%p899_p8)
}
  0x3a   : > { %s1050_s9 = smov 64   ;;  %s1051_s1 = smov 4  }
  0x3b   : > { %761 = dma.hbm_to_vmem [thread:$0]  (!%p1195_p1), %s1314_s0, 128, %s204_s11, [#allocation5], %s1050_s9, %s1050_s9, %s1051_s1  }
  0x3c   : > { %s914_s16 = scalar_lea.vmem %s217_s17, 1024  ;;  %p922_p12 = scmp.lt.s32.totalorder %s217_s17, %s217_s17 }
  0x3d   : > { %p915_p13 = scmp.ne.s32.totalorder %s217_s17, %s914_s16  ;;  %p923_p11 = scmp.lt.s32.totalorder %s914_s16, %s914_s16 }
  0x3f   : > { %p917_p3 = pnand %p915_p13, %p879_p4  ;;  %p924_p10 = por %p923_p11, %p922_p12 }
  0x41   : > { %p918_p6 = pneg %p917_p3 }
  0x43   : > { %p925_p5 = pnand %p924_p10, %p918_p6 }
  0x45   : > { %928 = shalt.err (!%p925_p5)
}
  0x46   : > { %764 = dma.hbm_to_vmem [thread:$0]  (!%p1195_p1), %s1317_s3, 1024, %s217_s17, [#allocation11], %s1050_s9, %s1050_s9, %s1051_s1  }
  0x47   : > { %s942_s11 = scalar_lea.vmem %s1206_s14, 64  ;;  %p1334_p13 = pneg %p1144_p7 }
  0x48   : > { %p943_p8 = scmp.ne.s32.totalorder %s1206_s14, %s942_s11  ;;  %s1052_s29 = smov [#allocation9]  }
  0x49   : > { %s947_s12 = sshll.u32 %s1052_s29, 4  ;;  %s948_s12 = int_to_ptr.vmem [resolvable:$false] %s947_s12 }
  0x4a   : > { %p945_p4 = pnand %p943_p8, %p1334_p13  ;;  %s949_s16 = scalar_lea.vmem %s948_s12, 128 }
  0x4b   : > { %p950_p11 = scmp.lt.s32.totalorder %s1206_s14, %s948_s12  ;;  %p951_p12 = scmp.lt.s32.totalorder %s949_s16, %s942_s11 }
  0x4c   : > { %p946_p9 = pneg %p945_p4 }
  0x4d   : > { %p952_p0 = por %p951_p12, %p950_p11 }
  0x4f   : > { %p953_p3 = pnand %p952_p0, %p946_p9 }
  0x51   : > { %956 = shalt.err (!%p953_p3)
}
  0x52   : > { %771 = dma.hbm_to_vmem [thread:$0]  (!%p1144_p7), %s1204_s24, 64, %s1206_s14, %s1149_s13  }
  0x53   : > { %272 = sbr.rel (%p1186_p2) target bundleno = 612 (0x264), region = 40  ;;  %p1335_p1 = scmp.eq.s32.totalorder (!%p1186_p2), %s1160_s25, 0 }
  0x58   : > { %1008 = dma.done.wait (%p1335_p1), [#allocation5], 128   ;;  %p1336_p6 = pmov %p1335_p1 }
  0x59   : > { %s278_s15 = sand.u32 1, %s1160_s25   ;;  %s280_s17 = sand.u32 1, %s1029_s19  }
  0x5a   : > { %1010 = vsyncadd (%p1336_p6), [#allocation5], 4294967168  ;;  %s1247_s10 = sshll.u32 %s280_s17, 2  ;;  %s279_s24 = scalar_lea.sflag [#allocation8], %s278_s15 }
  0x5b   : > { %s282_s13 = scalar_lea.vmem [#allocation7], %s1247_s10  ;;  %p1337_p7 = scmp.ne.s32.totalorder %s1329_s27, 0 }
  0x5d   : > { %1012 = dma.done.wait (%p1337_p7), %s279_s24, 128  }
  0x5e   : > { %1014 = vsyncadd (%p1337_p7), %s279_s24, 4294967168  ;;  %s291_s8 = scalar_lea.vmem [#allocation9], %s1247_s10  ;;  %p1338_p2 = pmov %p1335_p1 }
  0x5f   : > { %p1339_p10 = pmov %p1335_p1 }
  0x60   : > { %1016 = dma.done.wait (%p1338_p2), [#allocation11], 1024  }
  0x61   : > { %1018 = vsyncadd (%p1339_p10), [#allocation11], 4294966272  ;;  %v1053_v0 = vmov 0.0   ;;  %vm1054_vm0 = vmmov 0   ;;  %vm336_vm1 = vcmask 7168   ;;  %v1055_v1 = vmov 0  }
  0x62   : > { %718 = vmatprep.subr.bf16.mxu0 %v1053_v0  ;;  %720 = vmatprep.mubr.msk.bf16.mxu0 %vm1054_vm0, %v1053_v0  ;;  %337 = vst.msk [vmem:[#allocation3] sm:$0xff] %vm336_vm1, %v1053_v0  ;;  %v338_v2 = vld [vmem:[%s291_s8] sm:$0xf]  ;;  %v838_v3 = vld [vmem:[#allocation4] sm:$0xff]   ;;  %vm349_vm3 = vcmask 130048   ;;  %v840_v9 = vld [vmem:[#allocation10 + $0x30] sm:$0xff]  }
  0x63   : > { %837 = vset.pattern.permute.xlu0 %v1055_v1  ;;  %724 = vmatprep.subr.bf16.mxu1 %v1053_v0  ;;  %vm341_vm2 = vcmp.gt.bf16.partialorder %v338_v2, 0  ;;  %v839_v8 = vld [vmem:[#allocation10 + $0x38] sm:$0xff]   ;;  %v841_v10 = vld [vmem:[#allocation10 + $0x28] sm:$0xff]   ;;  %v842_v11 = vld [vmem:[#allocation10 + $0x20] sm:$0xff]   ;;  %s704_s14 = sshll.u32 %s1037_s21, 6  ;;  %s326_s9 = scalar_lea.vmem [#allocation12], %s1247_s10 }
  0x64   : > { %740 = vmatprep.mubr.msk.bf16.mxu1 %vm1054_vm0, %v1053_v0  ;;  %v396_v4 = vsel %vm341_vm2, 65537, %v1055_v1  ;;  %719 = vmatpush3.bf16.msra.mxu0 %v838_v3  ;;  %v843_v12 = vld [vmem:[#allocation10 + $0x18] sm:$0xff]   ;;  %v844_v13 = vld [vmem:[#allocation10 + $0x10] sm:$0xff]   ;;  %v845_v14 = vld [vmem:[#allocation10 + $0x8] sm:$0xff]   ;;  %s552_s1 = sshll.u32 %s326_s9, 4  ;;  %s1271_s11 = scalar_lea.hbm %s1319_s5, %s704_s14  ;;  %s553_s1 = int_to_ptr.vmem [resolvable:$true] %s552_s1 }
  0x65   : > { %v397_v5 = vunpack.c.l.b16 %v396_v4  ;;  %725 = vmatpush3.bf16.msra.mxu1 %v839_v8  ;;  %v846_v20 = vld [vmem:[#allocation10] sm:$0xff]   ;;  %v420_v26 = vld [vmem:[%s282_s13] sm:$0xf]  ;;  %s539_s29 = scalar_lea.sflag [#allocation6], %s280_s17  ;;  %s957_s12 = scalar_lea.vmem %s553_s1, 64 }
  0x66   : > { %726 = vmatprep.subr.bf16.mxu1 %v1053_v0  ;;  %v421_v27 = vunpack.c.l.bf16 %v420_v26  ;;  %v694_v32 = vld [vmem:[%s1318_s4] ss:$0 sm:$0xff]  ;;  %p958_p5 = scmp.ne.s32.totalorder %s553_s1, %s957_s12  ;;  %p1340_p8 = scmp.ne.s32.totalorder %s1330_s28, 0 }
  0x67   : > { %vm398_vm4 = vcmp.ne.s32.totalorder %v397_v5, 0  ;;  %721 = vmatmul.mubr.msk.bf16.vlgmr.msra.gmra.mxu0 %vm349_vm3, %v338_v2  ;;  %s1056_s21 = smov [#allocation12]  }
  0x68   : > { %v693_v6 = vsel %vm398_vm4, 1.0, %v1053_v0  ;;  %p959_p13 = pnand %p958_p5, %p1340_p8  ;;  %s961_s16 = sshll.u32 %s1056_s21, 4  ;;  %s962_s16 = int_to_ptr.vmem [resolvable:$false] %s961_s16 }
  0x69   : > { %v401_v7 = vsel %vm349_vm3, %v693_v6, 0.0  ;;  %727 = vmatpush3.bf16.msra.mxu1 %v840_v9  ;;  %v395_v15 = vld [vmem:[#allocation3] sm:$0xff]  ;;  %s963_s15 = scalar_lea.vmem %s962_s16, 128  ;;  %p964_p9 = scmp.lt.s32.totalorder %s553_s1, %s962_s16 }
  0x6a   : > { %402 = vadd.xlane.f32.xlu0 %v401_v7  ;;  %728 = vmatprep.subr.bf16.mxu1 %v1053_v0  ;;  %p960_p4 = pneg %p959_p13  ;;  %p965_p11 = scmp.lt.s32.totalorder %s963_s15, %s957_s12 }
  0x6c   : > { %p966_p12 = por %p965_p11, %p964_p9 }
  0x6d   : > { %729 = vmatpush3.bf16.msra.mxu1 %v841_v10 }
  0x6e   : > { %730 = vmatprep.subr.bf16.mxu1 %v1053_v0  ;;  %p967_p0 = pnand %p966_p12, %p960_p4 }
  0x71   : > { %731 = vmatpush3.bf16.msra.mxu1 %v842_v11 }
  0x72   : > { %732 = vmatprep.subr.bf16.mxu1 %v1053_v0 }
  0x75   : > { %733 = vmatpush3.bf16.msra.mxu1 %v843_v12 }
  0x76   : > { %734 = vmatprep.subr.bf16.mxu1 %v1053_v0 }
  0x79   : > { %735 = vmatpush3.bf16.msra.mxu1 %v844_v13 }
  0x7a   : > { %736 = vmatprep.subr.bf16.mxu1 %v1053_v0 }
  0x7d   : > { %737 = vmatpush3.bf16.msra.mxu1 %v845_v14 }
  0x7e   : > { %738 = vmatprep.subr.bf16.mxu1 %v1053_v0 }
  0x81   : > { %739 = vmatpush3.bf16.msra.mxu1 %v846_v20 }
  0xf3   : > { %v403_v16 = vpop.xlane.xlu0 %402 }
  0xf4   : > { %v404_v17 = vadd.f32 %v403_v16, %v395_v15 }
  0xf6   : > { %406 = vst.msk [vmem:[#allocation3] sm:$0xff] %vm336_vm1, %v404_v17 }
  0xfd   : > { %v410_v18 = vld [vmem:[#allocation3] sm:$0xff] }
  0xfe   : > { %v411_v19 = vmax.f32 %v410_v18, 1.0 }
 0x100   : > { %847 = vrcp.f32 %v411_v19 }
 0x10d   : > { %v848_v21 = vpop.eup %847 }
 0x10e   : > { %416 = vperm.xlu0 %837, %v848_v21  }
 0x127   : > { %v387_v22 = vpop.f32.mrf.mxu0 }
 0x129   : > { %v722_v23 = vpop.f32.mrf.mxu0 }
 0x12b   : > { %v390_v24 = vpop.f32.mrf.mxu0 }
 0x12d   : > { %v723_v25 = vpop.f32.mrf.mxu0 }
 0x189   : > { %v417_v28 = vpop.permute.xlu0 %416 }
 0x18a   : > { %v419_v29 = vmul.f32 %v417_v28, %v387_v22 }
 0x18c   : > { %v422_v30 = vadd.f32 %v421_v27, %v419_v29 }
 0x18e   : > { %v423_v31 = vpack.c.bf16 %v422_v30, %v422_v30 }
 0x190   : > { %741 = vmatmul.mubr.bf16.vlgmr.msra.gmra.mxu1 %v423_v31 }
 0x250   : > { %v529_v33 = vpop.f32.mrf.mxu1 }
 0x251   : > { %v530_v34 = vadd.f32 %v694_v32, %v529_v33 }
 0x252   : > { %v742_v35 = vpop.f32.mrf.mxu1 }
 0x253   : > { %v535_v36 = vmax.f32 %v530_v34, 0.0 }
 0x254   : > { %v532_v37 = vpop.f32.mrf.mxu1 }
 0x255   : > { %v536_v38 = vpack.c.bf16 %v535_v36, %v535_v36 }
 0x256   : > { %v743_v39 = vpop.f32.mrf.mxu1 }
 0x257   : > { %537 = vst [vmem:[%s326_s9] sm:$0xf] %v536_v38 }
 0x258   : > { %970 = shalt.err (!%p967_p0)
}
 0x259   : > { %s971_s10 = scalar_lea.hbm %s1271_s11, 64  ;;  %s975_s13 = scalar_lea.hbm %s1319_s5, 128 }
 0x25a   : > { %p972_p3 = scmp.ne.s32.totalorder %s1271_s11, %s971_s10  ;;  %p976_p7 = scmp.lt.s32.totalorder %s1271_s11, %s1319_s5 }
 0x25b   : > { %p977_p2 = scmp.lt.s32.totalorder %s975_s13, %s971_s10 }
 0x25c   : > { %p973_p1 = pnand %p972_p3, %p1340_p8 }
 0x25d   : > { %p978_p10 = por %p977_p2, %p976_p7 }
 0x25e   : > { %p974_p6 = pneg %p973_p1 }
 0x260   : > { %p979_p5 = pnand %p978_p10, %p974_p6 }
 0x262   : > { %982 = shalt.err (!%p979_p5)
}
 0x263   : > { %756 = dma.vmem_to_hbm [thread:$0]  (%p1340_p8), %s553_s1, 64, %s1271_s11, %s539_s29  }
 0x264 PF: > { %s564_s27 = sand.u32 1, %s1025_s18   ;;  %p1341_p13 = scmp.ne.s32.totalorder %s1331_s7, 0 }
 0x265   : > { %p1342_p4 = scmp.ge.s32.totalorder %s1045_s23, 2  ;;  %s565_s14 = scalar_lea.sflag [#allocation6], %s564_s27 }
 0x267   : > { %p773_p9 = pnand %p1342_p4, %p1341_p13 }
 0x269   : > { %p774_p11 = pneg %p773_p9 }
 0x26b   : > { %1020 = dma.done.wait (%p774_p11), %s565_s14, 64  }
 0x26c   : > { %1022 = vsyncadd (%p774_p11), %s565_s14, 4294967232  ;;  %s23_s23 = sadd.s32 1, %s1045_s23   ;;  %s1343_s28 = sld [smem:[#allocation17_spill]] }
 0x26d   : > { %p20_p12 = scmp.ge.s32.totalorder %s23_s23, 4   ;;  %s1344_s18 = smov %s1029_s19 }
 0x26e   : > { %s1345_s19 = smov %s1033_s20  ;;  %s1346_s20 = smov %s1135_s30 }
 0x26f   : > { %s1347_s21 = smov %s1041_s22  ;;  %22 = sbr.rel (!%p20_p12) target bundleno = 10 (0xa), region = 114 }
 0x272   : > { %s1348_s22 = smov %s1343_s28 }
 0x274   :  { %570 = vsyncpa [#allocation5], 1 }
 0x275   :  { %572 = vsyncpa [#allocation5 + $0x1], 1 }
 0x276   :  { %573 = vsyncpa [#allocation8], 1 }
 0x277   :  { %575 = vsyncpa [#allocation8 + $0x1], 1 }
 0x278   :  { %576 = vsyncpa [#allocation11], 1 }
 0x279   :  { %577 = vsyncpa [#allocation6], 1 }
 0x27a   :  { %579 = vsyncpa [#allocation6 + $0x1], 1 }

</bundles_post_ra>
